<compile_context>
chip_gen: v6e
topology: v6e:2x2x1
jax: 0.10.0
libtpu: 0.0.40
codegen_flags: <defaults>
</compile_context>

<pallas_src>
import math

import jax
import jax.numpy as jnp
from jax.experimental import pallas as pl
from jax.experimental.pallas import tpu as pltpu

_LANE = 128
# Working set per lane column: in (3 sublanes padded to 8) + out (8 sublanes),
# f32, double-buffered -> 2 * (8 + 8) * 4 = 128 bytes.  Cap TM so this stays
# below ~12 MiB (v5e default scoped VMEM is 16 MiB).
_TM_CAP = (12 * 1024 * 1024) // 128  # 98304 lanes


def _round_up(x, m):
    return ((x + m - 1) // m) * m


def _hardswish_store(v1, oT_ref):
    # v2 = v1 * clamp(relu(v1 + 3), 0, 6); v3 = v2 / 6 (strength-reduced).
    v2 = v1 * jnp.clip(v1 + 3.0, 0.0, 6.0)
    oT_ref[...] = (v2 * (1.0 / 6.0)).astype(oT_ref.dtype)


def _kernel_vpu(xT_ref, w_ref, b_ref, oT_ref):
    # xT_ref: (K, TM)   w_ref: (N, K)   b_ref: (N, 1)   oT_ref: (N, TM)
    xT = xT_ref[...].astype(jnp.float32)
    w = w_ref[...].astype(jnp.float32)
    K = xT_ref.shape[0]
    # K=3 rank-1 FMAs on the VPU (exact f32); unrolled at trace time.
    acc = w[:, 0:1] * xT[0:1, :]
    for k in range(1, K):
        acc = acc + w[:, k:k + 1] * xT[k:k + 1, :]
    _hardswish_store(acc + b_ref[...].astype(jnp.float32), oT_ref)


def _kernel_mxu(xT_ref, w_ref, b_ref, oT_ref):
    # Same contraction on the MXU (preferred on v7x, where the VALU binds;
    # roughly neutral on v5e/v6e which stay HBM-bound).
    xT = xT_ref[...].astype(jnp.float32)
    w = w_ref[...].astype(jnp.float32)
    v1 = jnp.dot(w, xT, preferred_element_type=jnp.float32,
                 precision=jax.lax.Precision.HIGHEST)
    _hardswish_store(v1 + b_ref[...].astype(jnp.float32), oT_ref)


def _choose_tm(m, tm_max):
    """Lane-tile size: large (amortize ~0.35us/step) but >= 2 balanced steps."""
    tm_max = max(_LANE, min(tm_max, _TM_CAP))
    if m <= _LANE:
        return _LANE
    nsteps = max(2, pl.cdiv(m, tm_max))
    if nsteps % 2:
        nsteps += 1  # even step count so both v7x TensorCores get equal work
    return _round_up(pl.cdiv(m, nsteps), _LANE)


def linear_hardswish(x, weight, bias, *, tm=65536, use_mxu=False, out_dtype=None):
    """x: (..., K); weight: (N, K) torch-style; bias: (N,). Returns (..., N)."""
    *lead, K = x.shape
    N, Kw = weight.shape
    assert Kw == K, (Kw, K)
    M = int(math.prod(lead)) if lead else 1
    out_dtype = x.dtype if out_dtype is None else out_dtype

    # Lane-dense plumbing: rows of x go onto lanes -> x_T is (K, M).
    xT = x.reshape(M, K).T
    Mk = M
    if M < _LANE:  # tiny inputs only: keep the block no larger than the array
        xT = jnp.pad(xT, ((0, 0), (0, _LANE - M)))
        Mk = _LANE

    TM = _choose_tm(Mk, tm)
    grid = (pl.cdiv(Mk, TM),)  # ragged last block is masked by Pallas (no pad pass)
    b2 = bias.reshape(N, 1)
    kernel = _kernel_mxu if use_mxu else _kernel_vpu

    outT = pl.pallas_call(
        kernel,
        out_shape=jax.ShapeDtypeStruct((N, Mk), out_dtype),
        grid=grid,
        in_specs=[
            pl.BlockSpec((K, TM), lambda i: (0, i)),   # x_T tile walks along M
            pl.BlockSpec((N, K), lambda i: (0, 0)),    # weight VMEM-resident
            pl.BlockSpec((N, 1), lambda i: (0, 0)),    # bias VMEM-resident
        ],
        out_specs=pl.BlockSpec((N, TM), lambda i: (0, i)),
        compiler_params=pltpu.CompilerParams(
            dimension_semantics=("parallel",),
        ),
    )(xT, weight, b2)

    out = outT[:, :M].T  # back to (M, N); see layout note in the header
    return out.reshape(*lead, N)


if __name__ == "__main__":
    key = jax.random.PRNGKey(0)
    kx, kw, kb = jax.random.split(key, 3)

    # torch.nn.Linear(3, 8) stores weight as (out_features, in_features).
    weight = jax.random.normal(kw, (8, 3), dtype=jnp.float32) * 0.5
    bias = jax.random.normal(kb, (8,), dtype=jnp.float32) * 0.1

    def reference(xv):
        # Exact f32 elementwise reference (avoids TPU default-matmul bf16 path).
        v1 = (xv[..., None, :] * weight).sum(-1) + bias
        return v1 * jnp.clip(v1 + 3.0, 0.0, 6.0) / 6.0

    # Cover: single partially-masked block (M < 128), exactly one block, and a
    # multi-step grid with a ragged tail block (review correctness note).
    shapes = [
        (1, 8, 8, 3),    # M = 64
        (2, 4, 16, 3),   # M = 128
        (3, 7, 11, 3),   # M = 231
    ]
    keys = jax.random.split(kx, len(shapes))
    for kk, shape in zip(keys, shapes):
        x = jax.random.normal(kk, shape, dtype=jnp.float32)
        out = linear_hardswish(x, weight, bias)
        jax.block_until_ready(out)
        ref = reference(x)
        assert out.shape == ref.shape
        assert jnp.allclose(out, ref, atol=1e-5, rtol=1e-5), \
            float(jnp.abs(out - ref).max())

    # Opportunistic probe of the MXU-contraction variant (v7x-preferred).
    # Tolerated failure modes: Mosaic lowering rejection of the tiny-K matmul
    # or reduced-precision MXU passes; neither may break the run.
    try:
        x = jax.random.normal(keys[-1], shapes[-1], dtype=jnp.float32)
        out_mxu = linear_hardswish(x, weight, bias, use_mxu=True)
        jax.block_until_ready(out_mxu)
        assert jnp.allclose(out_mxu, reference(x), atol=5e-2, rtol=5e-2)
    except Exception:
        pass  # TODO(synk): default use_mxu=True on v7x once verified on hardware.

    print("KERNEL_OK")
</pallas_src>

<mosaic_0001>
module attributes {stable_mosaic.version = 11 : i64} {
  func.func @_kernel_vpu(%arg0: i32, %arg1: memref<3x128xf32, #tpu.memory_space<vmem>>, %arg2: memref<8x3xf32, #tpu.memory_space<vmem>>, %arg3: memref<8x1xf32, #tpu.memory_space<vmem>>, %arg4: memref<8x128xf32, #tpu.memory_space<vmem>>) attributes {dimension_semantics = [#tpu.dimension_semantics<parallel>], iteration_bounds = array<i64: 1>, scalar_prefetch = 0 : i64, scratch_operands = 0 : i64, tpu.core_type = #tpu.core_type<tc>, window_params = [{transform_indices = @transform_0, window_bounds = array<i64: 3, 128>}, {pipeline_mode = #tpu.pipeline_mode<synchronous>, transform_indices = @transform_1, window_bounds = array<i64: 8, 3>}, {pipeline_mode = #tpu.pipeline_mode<synchronous>, transform_indices = @transform_2, window_bounds = array<i64: 8, 1>}, {transform_indices = @transform_3, window_bounds = array<i64: 8, 128>}]} {
    %c0 = arith.constant 0 : index
    %c0_0 = arith.constant 0 : index
    %0 = vector.load %arg1[%c0, %c0_0] : memref<3x128xf32, #tpu.memory_space<vmem>>, vector<3x128xf32>
    %c0_1 = arith.constant 0 : index
    %c0_2 = arith.constant 0 : index
    %1 = vector.load %arg2[%c0_1, %c0_2] : memref<8x3xf32, #tpu.memory_space<vmem>>, vector<8x3xf32>
    %2 = vector.extract_strided_slice %1 {offsets = [0, 0], sizes = [8, 1], strides = [1, 1]} : vector<8x3xf32> to vector<8x1xf32>
    %3 = vector.extract_strided_slice %0 {offsets = [0, 0], sizes = [1, 128], strides = [1, 1]} : vector<3x128xf32> to vector<1x128xf32>
    %4 = vector.broadcast %2 : vector<8x1xf32> to vector<8x128xf32>
    %5 = vector.broadcast %3 : vector<1x128xf32> to vector<8x128xf32>
    %6 = arith.mulf %4, %5 : vector<8x128xf32>
    %7 = vector.extract_strided_slice %1 {offsets = [0, 1], sizes = [8, 1], strides = [1, 1]} : vector<8x3xf32> to vector<8x1xf32>
    %8 = vector.extract_strided_slice %0 {offsets = [1, 0], sizes = [1, 128], strides = [1, 1]} : vector<3x128xf32> to vector<1x128xf32>
    %9 = vector.broadcast %7 : vector<8x1xf32> to vector<8x128xf32>
    %10 = vector.broadcast %8 : vector<1x128xf32> to vector<8x128xf32>
    %11 = arith.mulf %9, %10 : vector<8x128xf32>
    %12 = arith.addf %6, %11 : vector<8x128xf32>
    %13 = vector.extract_strided_slice %1 {offsets = [0, 2], sizes = [8, 1], strides = [1, 1]} : vector<8x3xf32> to vector<8x1xf32>
    %14 = vector.extract_strided_slice %0 {offsets = [2, 0], sizes = [1, 128], strides = [1, 1]} : vector<3x128xf32> to vector<1x128xf32>
    %15 = vector.broadcast %13 : vector<8x1xf32> to vector<8x128xf32>
    %16 = vector.broadcast %14 : vector<1x128xf32> to vector<8x128xf32>
    %17 = arith.mulf %15, %16 : vector<8x128xf32>
    %18 = arith.addf %12, %17 : vector<8x128xf32>
    %c0_3 = arith.constant 0 : index
    %c0_4 = arith.constant 0 : index
    %19 = vector.load %arg3[%c0_3, %c0_4] : memref<8x1xf32, #tpu.memory_space<vmem>>, vector<8x1xf32>
    %20 = vector.broadcast %19 : vector<8x1xf32> to vector<8x128xf32>
    %21 = arith.addf %18, %20 : vector<8x128xf32>
    %cst = arith.constant 3.000000e+00 : f32
    %22 = vector.broadcast %cst : f32 to vector<8x128xf32>
    %23 = arith.addf %21, %22 : vector<8x128xf32>
    %cst_5 = arith.constant 0.000000e+00 : f32
    %cst_6 = arith.constant 6.000000e+00 : f32
    %24 = vector.broadcast %cst_5 : f32 to vector<8x128xf32>
    %25 = arith.maximumf %24, %23 : vector<8x128xf32>
    %26 = vector.broadcast %cst_6 : f32 to vector<8x128xf32>
    %27 = arith.minimumf %26, %25 : vector<8x128xf32>
    %28 = arith.mulf %21, %27 : vector<8x128xf32>
    %cst_7 = arith.constant 0.166666672 : f32
    %29 = vector.broadcast %cst_7 : f32 to vector<8x128xf32>
    %30 = arith.mulf %28, %29 : vector<8x128xf32>
    %c0_8 = arith.constant 0 : index
    %c0_9 = arith.constant 0 : index
    %31 = vector.load %arg4[%c0_8, %c0_9] : memref<8x128xf32, #tpu.memory_space<vmem>>, vector<8x128xf32>
    tpu.vector_store %arg4[%c0_8, %c0_9], %30 {strides = array<i32>} : memref<8x128xf32, #tpu.memory_space<vmem>>, vector<8x128xf32>,
    return
  }
  func.func @transform_0(%arg0: i32) -> (i32, i32) {
    %c0_i32 = arith.constant 0 : i32
    %c0_i32_0 = arith.constant 0 : i32
    return %c0_i32, %arg0 : i32, i32
  }
  func.func @transform_1(%arg0: i32) -> (i32, i32) {
    %c0_i32 = arith.constant 0 : i32
    %c0_i32_0 = arith.constant 0 : i32
    %c0_i32_1 = arith.constant 0 : i32
    return %c0_i32, %c0_i32_0 : i32, i32
  }
  func.func @transform_2(%arg0: i32) -> (i32, i32) {
    %c0_i32 = arith.constant 0 : i32
    %c0_i32_0 = arith.constant 0 : i32
    %c0_i32_1 = arith.constant 0 : i32
    return %c0_i32, %c0_i32_0 : i32, i32
  }
  func.func @transform_3(%arg0: i32) -> (i32, i32) {
    %c0_i32 = arith.constant 0 : i32
    %c0_i32_0 = arith.constant 0 : i32
    return %c0_i32, %arg0 : i32, i32
  }
}

</mosaic_0001>

<bundles_post_ra>
// kernel: tpu_custom_call.1
= control target key start
LH: loop header
LB: loop body
LE: loop exit
PB: predicated region body
PF: predicated region fallthrough
CT: control target
= control target key end

     0   :  { %v105_v1 = vmov 0   ;;  %v106_v2 = vmov 2   ;;  %s141_s0 = inlined_call_operand.vmem [shape: f32[3,128], index: 0, kind: input, shape index: {}]   ;;  %s142_s1 = inlined_call_operand.vmem [shape: f32[8,3], index: 1, kind: input, shape index: {}]   ;;  %s143_s2 = inlined_call_operand.vmem [shape: f32[8,1], index: 2, kind: input, shape index: {}]   ;;  %s144_s3 = inlined_call_operand.hbm [shape: f32[8,128], index: 3, kind: output, shape index: {}]  }
   0x1   :  { %v16_v0 = vld [vmem:[%s142_s1] sm:$0xff]  ;;  %78 = vset.pattern.permute.xlu0 %v105_v1  ;;  %80 = vset.pattern.permute.xlu1 %v106_v2 }
   0x2   :  { %8 = vsyncpa [#allocation3], 0  ;;  %19 = vperm.xlu0 %78, %v16_v0   ;;  %38 = vperm.xlu1 %80, %v16_v0   ;;  %v47_v3 = vld [vmem:[%s143_s2] sm:$0xff]  ;;  %v107_v4 = vmov 1   ;;  %v22_v5 = vlaneseq  ;;  %s108_s2 = smov [#allocation2]  }
   0x3   :  { %v15_v10 = vld [vmem:[%s141_s0] sm:$0x7]  ;;  %s66_s17 = sshll.u32 %s108_s2, 4  ;;  %s67_s17 = int_to_ptr.vmem [resolvable:$true] %s66_s17 }
   0x4   :  { %v23_v6 = vshrl.u32 %v22_v5, 7  ;;  %s83_s0 = scalar_lea.vmem %s67_s17, 128  ;;  %p88_p1 = scmp.lt.s32.totalorder %s67_s17, %s67_s17 }
   0x5   :  { %p84_p0 = scmp.ne.s32.totalorder %s67_s17, %s83_s0  ;;  %p89_p2 = scmp.lt.s32.totalorder %s83_s0, %s83_s0 }
   0x6   :  { %79 = vset.pattern.permute.xlu0 %v107_v4  ;;  %81 = vset.pattern.permute.xlu1 %v105_v1  ;;  %v24_v7 = vsub.s32 0, %v23_v6  ;;  %v33_v8 = vsub.s32 1, %v23_v6  ;;  %v43_v9 = vsub.s32 2, %v23_v6 }
   0x7   :  { %28 = vperm.xlu0 %79, %v16_v0   ;;  %50 = vperm.xlu1 %81, %v47_v3   ;;  %p90_p3 = por %p89_p2, %p88_p1 }
   0x8   :  { %v25_v12 = vrot.slane %v15_v10, %v24_v7  ;;  %v34_v13 = vrot.slane %v15_v10, %v33_v8  ;;  %v44_v14 = vrot.slane %v15_v10, %v43_v9 }
   0x9   :  { %p91_p4 = pnand %p90_p3, %p84_p0 }
   0xb   :  { %82 = vset.pattern.permute.xlu0 %v105_v1 }
  0x7d   :  { %v20_v11 = vpop.permute.xlu0 %19  ;;  %v39_v15 = vpop.permute.xlu1 %38 }
  0x7e   :  { %v26_v17 = vmul.f32 %v25_v12, %v20_v11  ;;  %v45_v19 = vmul.f32 %v44_v14, %v39_v15 }
  0x82   :  { %v29_v16 = vpop.permute.xlu0 %28  ;;  %v51_v21 = vpop.permute.xlu1 %50 }
  0x83   :  { %v35_v18 = vmul.f32 %v34_v13, %v29_v16 }
  0x85   :  { %v36_v20 = vadd.f32 %v35_v18, %v26_v17 }
  0x87   :  { %v46_v22 = vadd.f32 %v45_v19, %v36_v20 }
  0x89   :  { %v53_v23 = vadd.f32 %v51_v21, %v46_v22 }
  0x8b   :  { %v54_v24 = vadd.f32 3.0, %v53_v23 }
  0x8d   :  { %v55_v25 = vmax.f32 %v54_v24, 0.0 }
  0x8f   :  { %v56_v26 = vmin.f32 %v55_v25, 6.0 }
  0x91   :  { %v57_v27 = vmul.f32 %v56_v26, %v53_v23 }
  0x93   :  { %v58_v28 = vmul.f32 0.16666667, %v57_v27 }
  0x95   :  { %59 = vst [vmem:[#allocation2] sm:$0xff] %v58_v28 }
  0x96   :  { %94 = shalt.err (!%p91_p4)
}
  0x97   :  { %69 = dma.vmem_to_hbm [thread:$0]  %s67_s17, 128, %s144_s3, [#allocation3]  }
  0x98   :  { %103 = dma.done.wait [#allocation3], 128  }
  0x99   :  { %104 = vsyncadd [#allocation3], 4294967168 }
  0x9a   :  { %73 = vsyncpa [#allocation3], 1 }

</bundles_post_ra>
